<compile_context>
chip_gen: v5e
topology: v5e:2x2
jax: 0.10.0
libtpu: 0.0.40
codegen_flags: <defaults>
</compile_context>

<pallas_src>
import jax
import jax.numpy as jnp
from jax.experimental import pallas as pl
from jax.experimental.pallas import tpu as pltpu

HIDDEN1 = 128
HIDDEN2 = 64
HIDDEN2_PAD = 128   # pad hidden-2 width 64 -> 128 lanes (zero cols/rows -> exact no-op)


def dqn_kernel(x_ref, w1_ref, b1_ref, w2_ref, b2_ref, w3_ref, b3_ref, o_ref):
    # Layer 1: cast x in-kernel (hidden under DMA), MXU matmul with f32 accumulation.
    x = x_ref[...].astype(w1_ref.dtype)
    h1 = jnp.dot(x, w1_ref[...], preferred_element_type=jnp.float32)
    h1 = jnp.maximum(h1 + b1_ref[...], 0.0)
    # Layer 2: Linear + ReLU, N padded to a full 128-lane width (lane-dense vregs).
    h2 = jnp.dot(h1.astype(w2_ref.dtype), w2_ref[...], preferred_element_type=jnp.float32)
    h2 = jnp.maximum(h2 + b2_ref[...], 0.0)
    # Layer 3: Linear straight to the narrow (out_size) output; rows of w3 are
    # zero-padded 64->128 to match h2, columns stay at the real output width.
    out = jnp.dot(h2.astype(w3_ref.dtype), w3_ref[...], preferred_element_type=jnp.float32)
    o_ref[...] = (out + b3_ref[...]).astype(o_ref.dtype)


def _round_up(n, m):
    return -(-n // m) * m


def prepare_params(params, *, use_bf16=True):
    """One-time (per parameter update) padding + casting, OFF the per-forward hot path.

    Returns VMEM-resident-ready weights: bf16 matmul operands (fast MXU path, half the
    DMA bytes) with f32 biases for the f32 accumulate/epilogue.  Padding is exact:
    ReLU(0 + 0) = 0 and zero rows/cols contribute nothing.
    """
    w1, b1, w2, b2, w3, b3 = (params[k] for k in ("w1", "b1", "w2", "b2", "w3", "b3"))
    assert w2.shape[1] == HIDDEN2 and w3.shape[0] == HIDDEN2
    mm_dtype = jnp.bfloat16 if use_bf16 else jnp.float32
    w2p = jnp.pad(w2, ((0, 0), (0, HIDDEN2_PAD - HIDDEN2)))
    b2p = jnp.pad(b2, ((0, 0), (0, HIDDEN2_PAD - HIDDEN2)))
    w3p = jnp.pad(w3, ((0, HIDDEN2_PAD - HIDDEN2), (0, 0)))   # pad rows only
    return dict(
        w1=w1.astype(mm_dtype), b1=b1,
        w2=w2p.astype(mm_dtype), b2=b2p,
        w3=w3p.astype(mm_dtype), b3=b3,
    )


def dqn_forward(x, prep, *, block_b=512):
    """x: [B, input_size] f32.  prep: output of prepare_params (padded / cast weights)."""
    B, in_size = x.shape
    out_size = prep["w3"].shape[1]

    # Batch tiling: multiple of 8 sublanes, big tile by default (512), but capped at
    # ceil(B/2) so the "parallel" grid has >= 2 blocks whenever B allows (keeps both
    # v7x TensorCores busy).  No batch padding: ragged last block is handled by Pallas
    # (OOB input rows only produce output rows that are never written back).
    block_b = _round_up(block_b, 8)
    TB = min(block_b, max(8, _round_up(-(-B // 2), 8)))
    n_blocks = pl.cdiv(B, TB)

    resident = lambda shape: pl.BlockSpec(shape, lambda i: (0,) * len(shape))

    flops = 2 * B * (in_size * HIDDEN1 + HIDDEN1 * HIDDEN2_PAD + HIDDEN2_PAD * out_size)
    bytes_accessed = (
        x.size * x.dtype.itemsize
        + sum(int(v.size) * v.dtype.itemsize for v in prep.values())
        + B * out_size * 4
    )

    return pl.pallas_call(
        dqn_kernel,
        out_shape=jax.ShapeDtypeStruct((B, out_size), jnp.float32),
        grid=(n_blocks,),
        in_specs=[
            pl.BlockSpec((TB, in_size), lambda i: (i, 0)),    # x: pipelined over batch blocks
            resident(prep["w1"].shape), resident(prep["b1"].shape),  # weights: VMEM-resident
            resident(prep["w2"].shape), resident(prep["b2"].shape),
            resident(prep["w3"].shape), resident(prep["b3"].shape),
        ],
        out_specs=pl.BlockSpec((TB, out_size), lambda i: (i, 0)),   # narrow, no post-slice
        compiler_params=pltpu.CompilerParams(
            dimension_semantics=("parallel",),   # shard batch blocks across v7x's 2 TCs
        ),
        cost_estimate=pl.CostEstimate(
            flops=flops, transcendentals=0, bytes_accessed=bytes_accessed),
    )(x, prep["w1"], prep["b1"], prep["w2"], prep["b2"], prep["w3"], prep["b3"])


def init_params(key, input_size, output_size):
    """Deterministic synthetic init (uniform, roughly matching nn.Linear scale)."""
    dims = [(input_size, HIDDEN1), (HIDDEN1, HIDDEN2), (HIDDEN2, output_size)]
    params = {}
    for i, (fan_in, fan_out) in enumerate(dims, start=1):
        key, kw, kb = jax.random.split(key, 3)
        bound = 1.0 / (fan_in ** 0.5)
        params[f"w{i}"] = jax.random.uniform(
            kw, (fan_in, fan_out), jnp.float32, minval=-bound, maxval=bound)
        # biases kept 2-D [1, fan_out] so they broadcast cleanly over batch in VMEM
        params[f"b{i}"] = jax.random.uniform(
            kb, (1, fan_out), jnp.float32, minval=-bound, maxval=bound)
    return params


def reference_forward(x, params):
    h1 = jnp.maximum(x @ params["w1"] + params["b1"], 0.0)
    h2 = jnp.maximum(h1 @ params["w2"] + params["b2"], 0.0)
    return h2 @ params["w3"] + params["b3"]


if __name__ == "__main__":
    INPUT_SIZE = 32   # e.g. flattened state observation
    OUTPUT_SIZE = 4   # e.g. 4 movement actions

    key = jax.random.PRNGKey(0)
    key, kx1, kx2 = jax.random.split(key, 3)
    params = init_params(key, INPUT_SIZE, OUTPUT_SIZE)

    # Pad/cast weights ONCE (per parameter update), outside the per-forward hot path.
    prep_bf16 = jax.tree_util.tree_map(
        jax.block_until_ready, prepare_params(params, use_bf16=True))
    prep_f32 = jax.tree_util.tree_map(
        jax.block_until_ready, prepare_params(params, use_bf16=False))

    fwd = jax.jit(dqn_forward, static_argnames=("block_b",))

    # Case 1: small batch, bf16 matmul fast path (single grid block).
    x_small = jax.random.normal(kx1, (8, INPUT_SIZE), jnp.float32)
    out_small = jax.block_until_ready(fwd(x_small, prep_bf16))
    ref_small = reference_forward(x_small, params)
    assert out_small.shape == (8, OUTPUT_SIZE)
    assert jnp.allclose(out_small, ref_small, atol=2e-2, rtol=2e-2)

    # Case 2: ragged multi-block batch (B=200 is not a multiple of TB=104), f32 -> exact.
    x_big = jax.random.normal(kx2, (200, INPUT_SIZE), jnp.float32)
    out_big = jax.block_until_ready(fwd(x_big, prep_f32))
    ref_big = reference_forward(x_big, params)
    assert out_big.shape == (200, OUTPUT_SIZE)
    assert jnp.allclose(out_big, ref_big, atol=1e-5, rtol=1e-5)

    print("KERNEL_OK")
</pallas_src>

<mosaic_0001>
module attributes {stable_mosaic.version = 11 : i64} {
  func.func @dqn_kernel(%arg0: i32, %arg1: memref<8x32xf32, #tpu.memory_space<vmem>>, %arg2: memref<32x128xbf16, #tpu.memory_space<vmem>>, %arg3: memref<1x128xf32, #tpu.memory_space<vmem>>, %arg4: memref<128x128xbf16, #tpu.memory_space<vmem>>, %arg5: memref<1x128xf32, #tpu.memory_space<vmem>>, %arg6: memref<128x4xbf16, #tpu.memory_space<vmem>>, %arg7: memref<1x4xf32, #tpu.memory_space<vmem>>, %arg8: memref<8x4xf32, #tpu.memory_space<vmem>>) attributes {dimension_semantics = [#tpu.dimension_semantics<parallel>], iteration_bounds = array<i64: 1>, scalar_prefetch = 0 : i64, scratch_operands = 0 : i64, tpu.core_type = #tpu.core_type<tc>, window_params = [{transform_indices = @transform_0, window_bounds = array<i64: 8, 32>}, {pipeline_mode = #tpu.pipeline_mode<synchronous>, transform_indices = @transform_1, window_bounds = array<i64: 32, 128>}, {pipeline_mode = #tpu.pipeline_mode<synchronous>, transform_indices = @transform_2, window_bounds = array<i64: 1, 128>}, {pipeline_mode = #tpu.pipeline_mode<synchronous>, transform_indices = @transform_3, window_bounds = array<i64: 128, 128>}, {pipeline_mode = #tpu.pipeline_mode<synchronous>, transform_indices = @transform_4, window_bounds = array<i64: 1, 128>}, {pipeline_mode = #tpu.pipeline_mode<synchronous>, transform_indices = @transform_5, window_bounds = array<i64: 128, 4>}, {pipeline_mode = #tpu.pipeline_mode<synchronous>, transform_indices = @transform_6, window_bounds = array<i64: 1, 4>}, {transform_indices = @transform_7, window_bounds = array<i64: 8, 4>}]} {
    %c0 = arith.constant 0 : index
    %c0_0 = arith.constant 0 : index
    %0 = vector.load %arg1[%c0, %c0_0] : memref<8x32xf32, #tpu.memory_space<vmem>>, vector<8x32xf32>
    %1 = arith.truncf %0 : vector<8x32xf32> to vector<8x32xbf16>
    %c0_1 = arith.constant 0 : index
    %c0_2 = arith.constant 0 : index
    %2 = vector.load %arg2[%c0_1, %c0_2] : memref<32x128xbf16, #tpu.memory_space<vmem>>, vector<32x128xbf16>
    %cst = arith.constant dense<0.000000e+00> : vector<8x128xf32>
    %3 = tpu.matmul %1, %2, %cst {dimension_numbers = #tpu.dot_dimension_numbers<[1], [0], [0], [1], [0, 0, 1, 1], [], []>} : vector<8x32xbf16>, vector<32x128xbf16>, vector<8x128xf32> -> vector<8x128xf32>
    %c0_3 = arith.constant 0 : index
    %c0_4 = arith.constant 0 : index
    %4 = vector.load %arg3[%c0_3, %c0_4] : memref<1x128xf32, #tpu.memory_space<vmem>>, vector<1x128xf32>
    %5 = vector.broadcast %4 : vector<1x128xf32> to vector<8x128xf32>
    %6 = arith.addf %3, %5 : vector<8x128xf32>
    %cst_5 = arith.constant 0.000000e+00 : f32
    %7 = vector.broadcast %cst_5 : f32 to vector<8x128xf32>
    %8 = arith.maximumf %6, %7 : vector<8x128xf32>
    %9 = arith.truncf %8 : vector<8x128xf32> to vector<8x128xbf16>
    %c0_6 = arith.constant 0 : index
    %c0_7 = arith.constant 0 : index
    %10 = vector.load %arg4[%c0_6, %c0_7] : memref<128x128xbf16, #tpu.memory_space<vmem>>, vector<128x128xbf16>
    %cst_8 = arith.constant dense<0.000000e+00> : vector<8x128xf32>
    %11 = tpu.matmul %9, %10, %cst_8 {dimension_numbers = #tpu.dot_dimension_numbers<[1], [0], [0], [1], [0, 0, 1, 1], [], []>} : vector<8x128xbf16>, vector<128x128xbf16>, vector<8x128xf32> -> vector<8x128xf32>
    %c0_9 = arith.constant 0 : index
    %c0_10 = arith.constant 0 : index
    %12 = vector.load %arg5[%c0_9, %c0_10] : memref<1x128xf32, #tpu.memory_space<vmem>>, vector<1x128xf32>
    %13 = vector.broadcast %12 : vector<1x128xf32> to vector<8x128xf32>
    %14 = arith.addf %11, %13 : vector<8x128xf32>
    %cst_11 = arith.constant 0.000000e+00 : f32
    %15 = vector.broadcast %cst_11 : f32 to vector<8x128xf32>
    %16 = arith.maximumf %14, %15 : vector<8x128xf32>
    %17 = arith.truncf %16 : vector<8x128xf32> to vector<8x128xbf16>
    %c0_12 = arith.constant 0 : index
    %c0_13 = arith.constant 0 : index
    %18 = vector.load %arg6[%c0_12, %c0_13] : memref<128x4xbf16, #tpu.memory_space<vmem>>, vector<128x4xbf16>
    %cst_14 = arith.constant dense<0.000000e+00> : vector<8x4xf32>
    %19 = tpu.matmul %17, %18, %cst_14 {dimension_numbers = #tpu.dot_dimension_numbers<[1], [0], [0], [1], [0, 0, 1, 1], [], []>} : vector<8x128xbf16>, vector<128x4xbf16>, vector<8x4xf32> -> vector<8x4xf32>
    %c0_15 = arith.constant 0 : index
    %c0_16 = arith.constant 0 : index
    %20 = vector.load %arg7[%c0_15, %c0_16] : memref<1x4xf32, #tpu.memory_space<vmem>>, vector<1x4xf32>
    %21 = vector.broadcast %20 : vector<1x4xf32> to vector<8x4xf32>
    %22 = arith.addf %19, %21 : vector<8x4xf32>
    %c0_17 = arith.constant 0 : index
    %c0_18 = arith.constant 0 : index
    %23 = vector.load %arg8[%c0_17, %c0_18] : memref<8x4xf32, #tpu.memory_space<vmem>>, vector<8x4xf32>
    tpu.vector_store %arg8[%c0_17, %c0_18], %22 {strides = array<i32>} : memref<8x4xf32, #tpu.memory_space<vmem>>, vector<8x4xf32>,
    return
  }
  func.func @transform_0(%arg0: i32) -> (i32, i32) {
    %c0_i32 = arith.constant 0 : i32
    %c0_i32_0 = arith.constant 0 : i32
    return %arg0, %c0_i32 : i32, i32
  }
  func.func @transform_1(%arg0: i32) -> (i32, i32) {
    %c0_i32 = arith.constant 0 : i32
    %c0_i32_0 = arith.constant 0 : i32
    %c0_i32_1 = arith.constant 0 : i32
    return %c0_i32, %c0_i32_0 : i32, i32
  }
  func.func @transform_2(%arg0: i32) -> (i32, i32) {
    %c0_i32 = arith.constant 0 : i32
    %c0_i32_0 = arith.constant 0 : i32
    %c0_i32_1 = arith.constant 0 : i32
    return %c0_i32, %c0_i32_0 : i32, i32
  }
  func.func @transform_3(%arg0: i32) -> (i32, i32) {
    %c0_i32 = arith.constant 0 : i32
    %c0_i32_0 = arith.constant 0 : i32
    %c0_i32_1 = arith.constant 0 : i32
    return %c0_i32, %c0_i32_0 : i32, i32
  }
  func.func @transform_4(%arg0: i32) -> (i32, i32) {
    %c0_i32 = arith.constant 0 : i32
    %c0_i32_0 = arith.constant 0 : i32
    %c0_i32_1 = arith.constant 0 : i32
    return %c0_i32, %c0_i32_0 : i32, i32
  }
  func.func @transform_5(%arg0: i32) -> (i32, i32) {
    %c0_i32 = arith.constant 0 : i32
    %c0_i32_0 = arith.constant 0 : i32
    %c0_i32_1 = arith.constant 0 : i32
    return %c0_i32, %c0_i32_0 : i32, i32
  }
  func.func @transform_6(%arg0: i32) -> (i32, i32) {
    %c0_i32 = arith.constant 0 : i32
    %c0_i32_0 = arith.constant 0 : i32
    %c0_i32_1 = arith.constant 0 : i32
    return %c0_i32, %c0_i32_0 : i32, i32
  }
  func.func @transform_7(%arg0: i32) -> (i32, i32) {
    %c0_i32 = arith.constant 0 : i32
    %c0_i32_0 = arith.constant 0 : i32
    return %arg0, %c0_i32 : i32, i32
  }
}

</mosaic_0001>

<bundles_post_ra>
// kernel: dqn_forward.1
= control target key start
LH: loop header
LB: loop body
LE: loop exit
PB: predicated region body
PF: predicated region fallthrough
CT: control target
= control target key end

     0   :  { %12 = vsyncpa [#allocation3], 0  ;;  %s530_s0 = inlined_call_operand.hbm [shape: f32[8,32], index: 0, kind: input, shape index: {}]   ;;  %s531_s1 = inlined_call_operand.hbm [shape: bf16[32,128], index: 1, kind: input, shape index: {}]   ;;  %s532_s2 = inlined_call_operand.vmem [shape: f32[1,128], index: 2, kind: input, shape index: {}]   ;;  %s533_s3 = inlined_call_operand.vmem [shape: bf16[128,128], index: 3, kind: input, shape index: {}]   ;;  %s534_s4 = inlined_call_operand.vmem [shape: f32[1,128], index: 4, kind: input, shape index: {}]   ;;  %s535_s5 = inlined_call_operand.vmem [shape: bf16[128,4], index: 5, kind: input, shape index: {}]   ;;  %s536_s6 = inlined_call_operand.vmem [shape: f32[1,4], index: 6, kind: input, shape index: {}]   ;;  %s537_s7 = inlined_call_operand.vmem [shape: f32[8,4], index: 7, kind: output, shape index: {}]  }
   0x1   :  { %s19_s26 = sshll.u32 %s530_s0, 4  ;;  %s20_s26 = int_to_ptr.hbm [resolvable:$true] %s19_s26 }
   0x2   :  { %13 = vsyncpa [#allocation5], 0  ;;  %s420_s27 = smov [#allocation2]   ;;  %s29_s8 = sshll.u32 %s531_s1, 4  ;;  %s30_s8 = int_to_ptr.hbm [resolvable:$true] %s29_s8 }
   0x3   :  { %s21_s28 = sshll.u32 %s420_s27, 4  ;;  %s421_s9 = smov [#allocation4]   ;;  %s22_s28 = int_to_ptr.vmem [resolvable:$true] %s21_s28 }
   0x4   :  { %24 = dma.hbm_to_vmem [thread:$0]  %s20_s26, 128, %s22_s28, [#allocation3]  }
   0x5   :  { %s31_s10 = sshll.u32 %s421_s9, 4  ;;  %s422_s11 = smov 64   ;;  %s32_s10 = int_to_ptr.vmem [resolvable:$true] %s31_s10 }
   0x6   :  { %s423_s12 = smov 4  }
   0x7   :  { %37 = dma.hbm_to_vmem [thread:$0]  %s30_s8, 256, %s32_s10, [#allocation5], %s422_s11, %s422_s11, %s423_s12  }
   0x8   :  { %416 = dma.done.wait [#allocation3], 128  }
   0x9   :  { %417 = vsyncadd [#allocation3], 4294967168 }
   0xa   :  { %418 = dma.done.wait [#allocation5], 256  }
   0xb   :  { %419 = vsyncadd [#allocation5], 4294967040  ;;  %v344_v0 = vld [vmem:[#allocation4 + $0x8] sm:$0xff]  ;;  %v352_v1 = vld [vmem:[%s533_s3 + $0x38] sm:$0xff]  ;;  %vm79_vm0 = vcmask 261120   ;;  %vm262_vm1 = vcmask 31744  }
   0xc   :  { %89 = vmatpush.bf16.msra.mxu0 %v344_v0  ;;  %v343_v2 = vld [vmem:[#allocation4] sm:$0xff]  ;;  %v57_v3 = vld [vmem:[#allocation2] sm:$0xff]  ;;  %166 = vmatpush.bf16.msra.mxu1 %v352_v1  ;;  %v351_v4 = vld [vmem:[%s533_s3 + $0x30] sm:$0xff] }
   0xd   :  { %v58_v5 = vpack.c.bf16 %v57_v3, %v57_v3  ;;  %v350_v6 = vld [vmem:[%s533_s3 + $0x28] sm:$0xff]  ;;  %v349_v7 = vld [vmem:[%s533_s3 + $0x20] sm:$0xff]  ;;  %v348_v8 = vld [vmem:[%s533_s3 + $0x18] sm:$0xff] }
   0xe   :  { %v347_v9 = vld [vmem:[%s533_s3 + $0x10] sm:$0xff]  ;;  %v346_v10 = vld [vmem:[%s533_s3 + $0x8] sm:$0xff]  ;;  %v345_v11 = vld [vmem:[%s533_s3] sm:$0xff] }
   0xf   :  { %v360_v12 = vld [vmem:[%s535_s5 + $0x38] sm:$0xff]  ;;  %v359_v13 = vld [vmem:[%s535_s5 + $0x30] sm:$0xff]  ;;  %v358_v14 = vld [vmem:[%s535_s5 + $0x28] sm:$0xff] }
  0x10   :  { %90 = vmatpush.bf16.msra.mxu0 %v343_v2  ;;  %167 = vmatpush.bf16.msra.mxu1 %v351_v4  ;;  %v357_v15 = vld [vmem:[%s535_s5 + $0x20] sm:$0xff]  ;;  %v356_v16 = vld [vmem:[%s535_s5 + $0x18] sm:$0xff]  ;;  %v355_v17 = vld [vmem:[%s535_s5 + $0x10] sm:$0xff] }
  0x11   :  { %249 = vmatpush.bf16.msra.mxu2 %v360_v12  ;;  %v365_v18 = vld [vmem:[%s532_s2] ss:$0 sm:$0xff]  ;;  %v354_v24 = vld [vmem:[%s535_s5 + $0x8] sm:$0xff] }
  0x12   :  { %v353_v25 = vld [vmem:[%s535_s5] sm:$0xff] }
  0x13   :  { %278 = vmatmul.msk.bf16.vlgmr.msra.gmra.mxu0 %vm79_vm0, %v58_v5  ;;  %v366_v26 = vld [vmem:[%s534_s4] ss:$0 sm:$0xff] }
  0x14   :  { %168 = vmatpush.bf16.msra.mxu1 %v350_v6  ;;  %v367_v32 = vld [vmem:[%s536_s6] ss:$0 sm:$0xff] }
  0x15   :  { %250 = vmatpush.bf16.msra.mxu2 %v359_v13 }
  0x18   :  { %169 = vmatpush.bf16.msra.mxu1 %v349_v7 }
  0x19   :  { %251 = vmatpush.bf16.msra.mxu2 %v358_v14 }
  0x1c   :  { %170 = vmatpush.bf16.msra.mxu1 %v348_v8 }
  0x1d   :  { %252 = vmatpush.bf16.msra.mxu2 %v357_v15 }
  0x20   :  { %171 = vmatpush.bf16.msra.mxu1 %v347_v9 }
  0x21   :  { %253 = vmatpush.bf16.msra.mxu2 %v356_v16 }
  0x24   :  { %172 = vmatpush.bf16.msra.mxu1 %v346_v10 }
  0x25   :  { %254 = vmatpush.bf16.msra.mxu2 %v355_v17 }
  0x28   :  { %173 = vmatpush.bf16.msra.mxu1 %v345_v11 }
  0x29   :  { %255 = vmatpush.bf16.msra.mxu2 %v354_v24 }
  0x2d   :  { %256 = vmatpush.bf16.msra.mxu2 %v353_v25 }
  0x90   :  { %v92_v19 = vpop.f32.mrf.mxu0 }
  0x91   :  { %v93_v20 = vadd.f32 %v365_v18, %v92_v19 }
  0x93   :  { %v96_v21 = vmax.f32 %v93_v20, 0.0 }
  0x95   :  { %v97_v22 = vpack.c.bf16 %v96_v21, %v96_v21 }
  0x97   :  { %174 = vmatmul.bf16.vlgmr.msra.gmra.mxu1 %v97_v22 }
  0x98   :  { %v94_v23 = vpop.f32.mrf.mxu0 }
 0x114   :  { %v175_v27 = vpop.f32.mrf.mxu1 }
 0x115   :  { %v176_v28 = vadd.f32 %v366_v26, %v175_v27 }
 0x117   :  { %v179_v29 = vmax.f32 %v176_v28, 0.0 }
 0x119   :  { %v180_v30 = vpack.c.bf16 %v179_v29, %v179_v29 }
 0x11b   :  { %257 = vmatmul.bf16.vlgmr.msra.gmra.mxu2 %v180_v30 }
 0x11c   :  { %v177_v31 = vpop.f32.mrf.mxu1 }
 0x19e   :  { %v258_v33 = vpop.f32.mrf.mxu2 }
 0x19f   :  { %v259_v34 = vadd.f32 %v367_v32, %v258_v33 }
 0x1a1   :  { %263 = vst.msk [vmem:[%s537_s7] sm:$0xff] %vm262_vm1, %v259_v34 }
 0x1a6   :  { %v260_v35 = vpop.f32.mrf.mxu2 }
 0x1a7   :  { %268 = vsyncpa [#allocation3], 1 }
 0x1a8   :  { %269 = vsyncpa [#allocation5], 1 }

</bundles_post_ra>
